<compile_context>
chip_gen: v7x
topology: tpu7x:2x2x1
jax: 0.10.0
libtpu: 0.0.40
codegen_flags: <defaults>
</compile_context>

<pallas_src>
import jax
import jax.numpy as jnp
from jax.experimental import pallas as pl
from jax.experimental.pallas import tpu as pltpu


def simplecnn_kernel(x_ref, wc_ref, w1_ref, aux_ref, out_ref):
    # x_ref:   (36, 128)  f32   row = h*6 + w, lane = c_in
    # wc_ref:  (1152, 64) bf16  row = (kh*3+kw)*128 + c_in, col = c_out
    # w1_ref:  (608, 32)  bf16  rows 0:576 = fc1 weight (row = p*64 + c); rows 576:608 = w2.T (lanes 0:2)
    # aux_ref: (40, 128)  f32   [0:36,0]=left-border mask (dw=-1), [0:36,1]=right-border mask (dw=+1),
    #                           [36,0:64]=conv bias, [37,0:32]=fc1 bias, [38,0:2]=fc2 bias
    x = x_ref[...]                                           # (36, 128) f32
    mask_l = aux_ref[0:36, 0:1]                              # 0.0 where w == 0
    mask_r = aux_ref[0:36, 1:2]                              # 0.0 where w == 5

    # ---- in-kernel im2col: each tap is a static sublane shift of zero-padded x + border mask ----
    zpad = jnp.zeros((7, 128), jnp.float32)
    xpad = jnp.concatenate([zpad, x, zpad], axis=0)          # (50, 128)
    taps = []
    for t in range(9):
        dh, dw = t // 3 - 1, t % 3 - 1
        off = 6 * dh + dw
        tap = xpad[7 + off:43 + off, :]                      # x[(h+dh)*6 + (w+dw)]; pad rows are 0
        if dw == -1:
            tap = tap * mask_l                               # kill w-boundary wraparound (left)
        elif dw == 1:
            tap = tap * mask_r                               # kill w-boundary wraparound (right)
        taps.append(tap.astype(jnp.bfloat16))
    patches = jnp.concatenate(taps, axis=1)                  # (36, 1152) bf16, col = (kh*3+kw)*128 + c_in

    # ---- conv1: ONE K=1152 bf16 MXU matmul (f32 accumulate) + VPU bias add + ReLU ----
    conv = jnp.dot(patches, wc_ref[...],
                   preferred_element_type=jnp.float32)       # (36, 64) f32
    conv = jnp.maximum(conv + aux_ref[36:37, 0:64], 0.0)

    # ---- maxpool 2x2 stride 2 (rows r = h*6 + w) ----
    # h-pairs are contiguous 6-row slabs; w-pair max is fused into the flatten below.
    hp = jnp.concatenate(
        [jnp.maximum(conv[12 * ph:12 * ph + 6, :], conv[12 * ph + 6:12 * ph + 12, :])
         for ph in range(3)], axis=0)                        # (18, 64), row = ph*6 + w
    flat = jnp.concatenate(
        [jnp.maximum(hp[6 * ph + 2 * pw:6 * ph + 2 * pw + 1, :],
                     hp[6 * ph + 2 * pw + 1:6 * ph + 2 * pw + 2, :])
         for ph in range(3) for pw in range(3)], axis=1)     # (1, 576), col = (ph*3+pw)*64 + c

    # ---- fc1 (one K=576 matmul) + ReLU, fc2 ----
    h1 = jnp.dot(flat.astype(jnp.bfloat16), w1_ref[0:576, :],
                 preferred_element_type=jnp.float32) + aux_ref[37:38, 0:32]
    h1 = jnp.maximum(h1, 0.0)                                # (1, 32) f32
    y2 = jnp.dot(h1.astype(jnp.bfloat16), w1_ref[576:608, :],
                 preferred_element_type=jnp.float32)         # (1, 32); lanes 2: are zero
    out_ref[...] = y2[:, 0:2] + aux_ref[38:39, 0:2]


def prepare_params(wc, bc, w1, b1, w2, b2):
    """One-time parameter layout transforms (hoisted out of the per-call path)."""
    wc = jnp.asarray(wc, jnp.float32)
    bc = jnp.asarray(bc, jnp.float32)
    w1 = jnp.asarray(w1, jnp.float32)
    b1 = jnp.asarray(b1, jnp.float32)
    w2 = jnp.asarray(w2, jnp.float32)
    b2 = jnp.asarray(b2, jnp.float32)

    # conv weight (64,128,3,3) OIHW -> (1152, 64): row = (kh*3+kw)*128 + c_in (bf16 MXU operand)
    wc_mat = wc.transpose(2, 3, 1, 0).reshape(9 * 128, 64).astype(jnp.bfloat16)

    # fc1 weight (32, 576) [col = c*9 + p] -> (576, 32) with row = p*64 + c (matches kernel flatten),
    # then append w2.T zero-padded to 32 lanes as rows 576:608 -> one bf16 buffer, one DMA.
    w1m = w1.reshape(32, 64, 9).transpose(2, 1, 0).reshape(576, 32)
    w2t = jnp.zeros((32, 32), jnp.float32).at[:, 0:2].set(w2.T)
    w1aug = jnp.concatenate([w1m, w2t], axis=0).astype(jnp.bfloat16)      # (608, 32)

    # aux buffer (40, 128) f32: conv border masks + all biases (kept f32) -> one small DMA.
    w_coord = jnp.arange(36) % 6
    aux = jnp.zeros((40, 128), jnp.float32)
    aux = aux.at[0:36, 0].set((w_coord >= 1).astype(jnp.float32))   # valid mask for dw = -1 taps
    aux = aux.at[0:36, 1].set((w_coord <= 4).astype(jnp.float32))   # valid mask for dw = +1 taps
    aux = aux.at[36, 0:64].set(bc)
    aux = aux.at[37, 0:32].set(b1)
    aux = aux.at[38, 0:2].set(b2)
    return wc_mat, w1aug, aux


@jax.jit
def simple_cnn_forward(x, wc_mat, w1aug, aux):
    """x: any shape with 1*128*6*6 elements (module reshapes it). Returns (1, 2) f32."""
    # Only prologue op: lane-dense (36, 128) slab, row = h*6 + w, lane = c_in.
    x_slab = x.reshape(128, 36).T.astype(jnp.float32)
    vmem = pl.BlockSpec(memory_space=pltpu.MemorySpace.VMEM)
    return pl.pallas_call(
        simplecnn_kernel,
        out_shape=jax.ShapeDtypeStruct((1, 2), jnp.float32),
        in_specs=[vmem, vmem, vmem, vmem],
        out_specs=vmem,
    )(x_slab, wc_mat, w1aug, aux)


def ref_forward(x, wc, bc, w1, b1, w2, b2):
    """Pure-JAX f32 reference matching the PyTorch forward exactly."""
    x = x.reshape(1, 128, 6, 6).astype(jnp.float32)
    y = jax.lax.conv_general_dilated(
        x, wc, window_strides=(1, 1), padding=((1, 1), (1, 1)),
        dimension_numbers=("NCHW", "OIHW", "NCHW"))
    y = jax.nn.relu(y + bc.reshape(1, 64, 1, 1))
    y = jax.lax.reduce_window(y, -jnp.inf, jax.lax.max,
                              (1, 1, 2, 2), (1, 1, 2, 2), "VALID")
    y = y.reshape(1, 64 * 3 * 3)
    h = jax.nn.relu(y @ w1.T + b1)
    return h @ w2.T + b2


if __name__ == "__main__":
    key = jax.random.PRNGKey(0)
    kx, kwc, kbc, kw1, kb1, kw2, kb2 = jax.random.split(key, 7)

    # deterministic synthetic parameters (shapes from SimpleCNN.__init__)
    wc = jax.random.normal(kwc, (64, 128, 3, 3), jnp.float32) * 0.05
    bc = jax.random.normal(kbc, (64,), jnp.float32) * 0.05
    w1 = jax.random.normal(kw1, (32, 64 * 3 * 3), jnp.float32) * 0.05
    b1 = jax.random.normal(kb1, (32,), jnp.float32) * 0.05
    w2 = jax.random.normal(kw2, (2, 32), jnp.float32) * 0.05
    b2 = jax.random.normal(kb2, (2,), jnp.float32) * 0.05

    # input: the forward reshapes to (1, 128, 6, 6), so the element count is fixed (batch=1)
    x = jax.random.normal(kx, (1, 128, 6, 6), jnp.float32)

    # weight layouts precomputed ONCE (not in the per-call path)
    params = jax.block_until_ready(prepare_params(wc, bc, w1, b1, w2, b2))

    out = jax.block_until_ready(simple_cnn_forward(x, *params))

    ref = ref_forward(x, wc, bc, w1, b1, w2, b2)
    assert out.shape == (1, 2)
    # bf16 MXU operands (f32 accumulation) -> tolerance loosened vs the f32-only version
    assert jnp.allclose(out, ref, atol=2e-2, rtol=2e-2), (out, ref)

    print("KERNEL_OK")
</pallas_src>

<mosaic_0001>
module attributes {stable_mosaic.version = 11 : i64} {
  func.func @simplecnn_kernel(%arg0: memref<36x128xf32, #tpu.memory_space<vmem>>, %arg1: memref<1152x64xbf16, #tpu.memory_space<vmem>>, %arg2: memref<608x32xbf16, #tpu.memory_space<vmem>>, %arg3: memref<40x128xf32, #tpu.memory_space<vmem>>, %arg4: memref<1x2xf32, #tpu.memory_space<vmem>>) attributes {dimension_semantics = [], scalar_prefetch = 0 : i64, scratch_operands = 0 : i64, tpu.core_type = #tpu.core_type<tc>} {
    %c0 = arith.constant 0 : index
    %c0_0 = arith.constant 0 : index
    %0 = vector.load %arg0[%c0, %c0_0] : memref<36x128xf32, #tpu.memory_space<vmem>>, vector<36x128xf32>
    %c0_1 = arith.constant 0 : index
    %c0_2 = arith.constant 0 : index
    %1 = vector.load %arg3[%c0_1, %c0_2] : memref<40x128xf32, #tpu.memory_space<vmem>>, vector<36x1xf32>
    %c0_3 = arith.constant 0 : index
    %c1 = arith.constant 1 : index
    %2 = vector.load %arg3[%c0_3, %c1] : memref<40x128xf32, #tpu.memory_space<vmem>>, vector<36x1xf32>
    %cst = arith.constant 0.000000e+00 : f32
    %3 = vector.broadcast %cst : f32 to vector<7x128xf32>
    %4 = tpu.concatenate %3, %0, %3 in 0 : vector<7x128xf32>, vector<36x128xf32>, vector<7x128xf32> -> vector<50x128xf32>
    %5 = vector.extract_strided_slice %4 {offsets = [0, 0], sizes = [36, 128], strides = [1, 1]} : vector<50x128xf32> to vector<36x128xf32>
    %6 = vector.broadcast %1 : vector<36x1xf32> to vector<36x128xf32>
    %7 = arith.mulf %5, %6 : vector<36x128xf32>
    %8 = arith.truncf %7 : vector<36x128xf32> to vector<36x128xbf16>
    %9 = vector.extract_strided_slice %4 {offsets = [1, 0], sizes = [36, 128], strides = [1, 1]} : vector<50x128xf32> to vector<36x128xf32>
    %10 = arith.truncf %9 : vector<36x128xf32> to vector<36x128xbf16>
    %11 = vector.extract_strided_slice %4 {offsets = [2, 0], sizes = [36, 128], strides = [1, 1]} : vector<50x128xf32> to vector<36x128xf32>
    %12 = vector.broadcast %2 : vector<36x1xf32> to vector<36x128xf32>
    %13 = arith.mulf %11, %12 : vector<36x128xf32>
    %14 = arith.truncf %13 : vector<36x128xf32> to vector<36x128xbf16>
    %15 = vector.extract_strided_slice %4 {offsets = [6, 0], sizes = [36, 128], strides = [1, 1]} : vector<50x128xf32> to vector<36x128xf32>
    %16 = vector.broadcast %1 : vector<36x1xf32> to vector<36x128xf32>
    %17 = arith.mulf %15, %16 : vector<36x128xf32>
    %18 = arith.truncf %17 : vector<36x128xf32> to vector<36x128xbf16>
    %19 = vector.extract_strided_slice %4 {offsets = [7, 0], sizes = [36, 128], strides = [1, 1]} : vector<50x128xf32> to vector<36x128xf32>
    %20 = arith.truncf %19 : vector<36x128xf32> to vector<36x128xbf16>
    %21 = vector.extract_strided_slice %4 {offsets = [8, 0], sizes = [36, 128], strides = [1, 1]} : vector<50x128xf32> to vector<36x128xf32>
    %22 = vector.broadcast %2 : vector<36x1xf32> to vector<36x128xf32>
    %23 = arith.mulf %21, %22 : vector<36x128xf32>
    %24 = arith.truncf %23 : vector<36x128xf32> to vector<36x128xbf16>
    %25 = vector.extract_strided_slice %4 {offsets = [12, 0], sizes = [36, 128], strides = [1, 1]} : vector<50x128xf32> to vector<36x128xf32>
    %26 = vector.broadcast %1 : vector<36x1xf32> to vector<36x128xf32>
    %27 = arith.mulf %25, %26 : vector<36x128xf32>
    %28 = arith.truncf %27 : vector<36x128xf32> to vector<36x128xbf16>
    %29 = vector.extract_strided_slice %4 {offsets = [13, 0], sizes = [36, 128], strides = [1, 1]} : vector<50x128xf32> to vector<36x128xf32>
    %30 = arith.truncf %29 : vector<36x128xf32> to vector<36x128xbf16>
    %31 = vector.extract_strided_slice %4 {offsets = [14, 0], sizes = [36, 128], strides = [1, 1]} : vector<50x128xf32> to vector<36x128xf32>
    %32 = vector.broadcast %2 : vector<36x1xf32> to vector<36x128xf32>
    %33 = arith.mulf %31, %32 : vector<36x128xf32>
    %34 = arith.truncf %33 : vector<36x128xf32> to vector<36x128xbf16>
    %35 = tpu.concatenate %8, %10, %14, %18, %20, %24, %28, %30, %34 in 1 : vector<36x128xbf16>, vector<36x128xbf16>, vector<36x128xbf16>, vector<36x128xbf16>, vector<36x128xbf16>, vector<36x128xbf16>, vector<36x128xbf16>, vector<36x128xbf16>, vector<36x128xbf16> -> vector<36x1152xbf16>
    %c0_4 = arith.constant 0 : index
    %c0_5 = arith.constant 0 : index
    %36 = vector.load %arg1[%c0_4, %c0_5] : memref<1152x64xbf16, #tpu.memory_space<vmem>>, vector<1152x64xbf16>
    %cst_6 = arith.constant dense<0.000000e+00> : vector<36x64xf32>
    %37 = tpu.matmul %35, %36, %cst_6 {dimension_numbers = #tpu.dot_dimension_numbers<[1], [0], [0], [1], [0, 0, 1, 1], [], []>} : vector<36x1152xbf16>, vector<1152x64xbf16>, vector<36x64xf32> -> vector<36x64xf32>
    %c36 = arith.constant 36 : index
    %c0_7 = arith.constant 0 : index
    %38 = vector.load %arg3[%c36, %c0_7] : memref<40x128xf32, #tpu.memory_space<vmem>>, vector<1x64xf32>
    %39 = vector.broadcast %38 : vector<1x64xf32> to vector<36x64xf32>
    %40 = arith.addf %37, %39 : vector<36x64xf32>
    %cst_8 = arith.constant 0.000000e+00 : f32
    %41 = vector.broadcast %cst_8 : f32 to vector<36x64xf32>
    %42 = arith.maximumf %40, %41 : vector<36x64xf32>
    %43 = vector.extract_strided_slice %42 {offsets = [0, 0], sizes = [6, 64], strides = [1, 1]} : vector<36x64xf32> to vector<6x64xf32>
    %44 = vector.extract_strided_slice %42 {offsets = [6, 0], sizes = [6, 64], strides = [1, 1]} : vector<36x64xf32> to vector<6x64xf32>
    %45 = arith.maximumf %43, %44 : vector<6x64xf32>
    %46 = vector.extract_strided_slice %42 {offsets = [12, 0], sizes = [6, 64], strides = [1, 1]} : vector<36x64xf32> to vector<6x64xf32>
    %47 = vector.extract_strided_slice %42 {offsets = [18, 0], sizes = [6, 64], strides = [1, 1]} : vector<36x64xf32> to vector<6x64xf32>
    %48 = arith.maximumf %46, %47 : vector<6x64xf32>
    %49 = vector.extract_strided_slice %42 {offsets = [24, 0], sizes = [6, 64], strides = [1, 1]} : vector<36x64xf32> to vector<6x64xf32>
    %50 = vector.extract_strided_slice %42 {offsets = [30, 0], sizes = [6, 64], strides = [1, 1]} : vector<36x64xf32> to vector<6x64xf32>
    %51 = arith.maximumf %49, %50 : vector<6x64xf32>
    %52 = tpu.concatenate %45, %48, %51 in 0 : vector<6x64xf32>, vector<6x64xf32>, vector<6x64xf32> -> vector<18x64xf32>
    %53 = vector.extract_strided_slice %52 {offsets = [0, 0], sizes = [1, 64], strides = [1, 1]} : vector<18x64xf32> to vector<1x64xf32>
    %54 = vector.extract_strided_slice %52 {offsets = [1, 0], sizes = [1, 64], strides = [1, 1]} : vector<18x64xf32> to vector<1x64xf32>
    %55 = arith.maximumf %53, %54 : vector<1x64xf32>
    %56 = vector.extract_strided_slice %52 {offsets = [2, 0], sizes = [1, 64], strides = [1, 1]} : vector<18x64xf32> to vector<1x64xf32>
    %57 = vector.extract_strided_slice %52 {offsets = [3, 0], sizes = [1, 64], strides = [1, 1]} : vector<18x64xf32> to vector<1x64xf32>
    %58 = arith.maximumf %56, %57 : vector<1x64xf32>
    %59 = vector.extract_strided_slice %52 {offsets = [4, 0], sizes = [1, 64], strides = [1, 1]} : vector<18x64xf32> to vector<1x64xf32>
    %60 = vector.extract_strided_slice %52 {offsets = [5, 0], sizes = [1, 64], strides = [1, 1]} : vector<18x64xf32> to vector<1x64xf32>
    %61 = arith.maximumf %59, %60 : vector<1x64xf32>
    %62 = vector.extract_strided_slice %52 {offsets = [6, 0], sizes = [1, 64], strides = [1, 1]} : vector<18x64xf32> to vector<1x64xf32>
    %63 = vector.extract_strided_slice %52 {offsets = [7, 0], sizes = [1, 64], strides = [1, 1]} : vector<18x64xf32> to vector<1x64xf32>
    %64 = arith.maximumf %62, %63 : vector<1x64xf32>
    %65 = vector.extract_strided_slice %52 {offsets = [8, 0], sizes = [1, 64], strides = [1, 1]} : vector<18x64xf32> to vector<1x64xf32>
    %66 = vector.extract_strided_slice %52 {offsets = [9, 0], sizes = [1, 64], strides = [1, 1]} : vector<18x64xf32> to vector<1x64xf32>
    %67 = arith.maximumf %65, %66 : vector<1x64xf32>
    %68 = vector.extract_strided_slice %52 {offsets = [10, 0], sizes = [1, 64], strides = [1, 1]} : vector<18x64xf32> to vector<1x64xf32>
    %69 = vector.extract_strided_slice %52 {offsets = [11, 0], sizes = [1, 64], strides = [1, 1]} : vector<18x64xf32> to vector<1x64xf32>
    %70 = arith.maximumf %68, %69 : vector<1x64xf32>
    %71 = vector.extract_strided_slice %52 {offsets = [12, 0], sizes = [1, 64], strides = [1, 1]} : vector<18x64xf32> to vector<1x64xf32>
    %72 = vector.extract_strided_slice %52 {offsets = [13, 0], sizes = [1, 64], strides = [1, 1]} : vector<18x64xf32> to vector<1x64xf32>
    %73 = arith.maximumf %71, %72 : vector<1x64xf32>
    %74 = vector.extract_strided_slice %52 {offsets = [14, 0], sizes = [1, 64], strides = [1, 1]} : vector<18x64xf32> to vector<1x64xf32>
    %75 = vector.extract_strided_slice %52 {offsets = [15, 0], sizes = [1, 64], strides = [1, 1]} : vector<18x64xf32> to vector<1x64xf32>
    %76 = arith.maximumf %74, %75 : vector<1x64xf32>
    %77 = vector.extract_strided_slice %52 {offsets = [16, 0], sizes = [1, 64], strides = [1, 1]} : vector<18x64xf32> to vector<1x64xf32>
    %78 = vector.extract_strided_slice %52 {offsets = [17, 0], sizes = [1, 64], strides = [1, 1]} : vector<18x64xf32> to vector<1x64xf32>
    %79 = arith.maximumf %77, %78 : vector<1x64xf32>
    %80 = tpu.concatenate %55, %58, %61, %64, %67, %70, %73, %76, %79 in 1 : vector<1x64xf32>, vector<1x64xf32>, vector<1x64xf32>, vector<1x64xf32>, vector<1x64xf32>, vector<1x64xf32>, vector<1x64xf32>, vector<1x64xf32>, vector<1x64xf32> -> vector<1x576xf32>
    %81 = arith.truncf %80 : vector<1x576xf32> to vector<1x576xbf16>
    %c0_9 = arith.constant 0 : index
    %c0_10 = arith.constant 0 : index
    %82 = vector.load %arg2[%c0_9, %c0_10] : memref<608x32xbf16, #tpu.memory_space<vmem>>, vector<576x32xbf16>
    %cst_11 = arith.constant dense<0.000000e+00> : vector<1x32xf32>
    %83 = tpu.matmul %81, %82, %cst_11 {dimension_numbers = #tpu.dot_dimension_numbers<[1], [0], [0], [1], [0, 0, 1, 1], [], []>} : vector<1x576xbf16>, vector<576x32xbf16>, vector<1x32xf32> -> vector<1x32xf32>
    %c37 = arith.constant 37 : index
    %c0_12 = arith.constant 0 : index
    %84 = vector.load %arg3[%c37, %c0_12] : memref<40x128xf32, #tpu.memory_space<vmem>>, vector<1x32xf32>
    %85 = arith.addf %83, %84 : vector<1x32xf32>
    %cst_13 = arith.constant 0.000000e+00 : f32
    %86 = vector.broadcast %cst_13 : f32 to vector<1x32xf32>
    %87 = arith.maximumf %85, %86 : vector<1x32xf32>
    %88 = arith.truncf %87 : vector<1x32xf32> to vector<1x32xbf16>
    %c576 = arith.constant 576 : index
    %c0_14 = arith.constant 0 : index
    %89 = vector.load %arg2[%c576, %c0_14] : memref<608x32xbf16, #tpu.memory_space<vmem>>, vector<32x32xbf16>
    %cst_15 = arith.constant dense<0.000000e+00> : vector<1x32xf32>
    %90 = tpu.matmul %88, %89, %cst_15 {dimension_numbers = #tpu.dot_dimension_numbers<[1], [0], [0], [1], [0, 0, 1, 1], [], []>} : vector<1x32xbf16>, vector<32x32xbf16>, vector<1x32xf32> -> vector<1x32xf32>
    %91 = vector.extract_strided_slice %90 {offsets = [0, 0], sizes = [1, 2], strides = [1, 1]} : vector<1x32xf32> to vector<1x2xf32>
    %c38 = arith.constant 38 : index
    %c0_16 = arith.constant 0 : index
    %92 = vector.load %arg3[%c38, %c0_16] : memref<40x128xf32, #tpu.memory_space<vmem>>, vector<1x2xf32>
    %93 = arith.addf %91, %92 : vector<1x2xf32>
    %c0_17 = arith.constant 0 : index
    %c0_18 = arith.constant 0 : index
    %94 = vector.load %arg4[%c0_17, %c0_18] : memref<1x2xf32, #tpu.memory_space<vmem>>, vector<1x2xf32>
    tpu.vector_store %arg4[%c0_17, %c0_18], %93 {strides = array<i32>} : memref<1x2xf32, #tpu.memory_space<vmem>>, vector<1x2xf32>,
    return
  }
}

</mosaic_0001>

<bundles_post_ra>
// kernel: simple_cnn_forward.1
= control target key start
LH: loop header
LB: loop body
LE: loop exit
PB: predicated region body
PF: predicated region fallthrough
CT: control target
= control target key end

     0   :  { %v2287_v2 = vmov 0   ;;  %v2288_v12 = vmov 1   ;;  %vm34_vm0 = vcmask 1046528   ;;  %vm216_vm1 = vsmask.f32 7424  ;;  %s2899_s0 = inlined_call_operand.vmem [shape: f32[36,128], index: 0, kind: input, shape index: {}]   ;;  %s2900_s1 = inlined_call_operand.vmem [shape: bf16[1152,64], index: 1, kind: input, shape index: {}]   ;;  %s2901_s2 = inlined_call_operand.vmem [shape: bf16[608,32], index: 2, kind: input, shape index: {}]   ;;  %s2902_s3 = inlined_call_operand.vmem [shape: f32[40,128], index: 3, kind: input, shape index: {}]   ;;  %s2903_s4 = inlined_call_operand.hbm [shape: f32[1,2], index: 4, kind: output, shape index: {}]  }
   0x1   :  { %v26_v0 = vld [vmem:[%s2902_s3 + $0x10] sm:$0xff]  ;;  %v24_v1 = vld [vmem:[%s2902_s3] sm:$0xff]  ;;  %2139 = vset.pattern.permute.xlu1 %v2287_v2  ;;  %2138 = vset.pattern.permute.xlu0 %v2287_v2  ;;  %v27_v3 = vld [vmem:[%s2902_s3 + $0x18] sm:$0xff]  ;;  %vm51_vm2 = vcmask 1042432   ;;  %vm267_vm3 = vsmask.f32 4352 }
   0x2   :  { %v25_v4 = vld [vmem:[%s2902_s3 + $0x8] sm:$0xff]  ;;  %65 = vperm.xlu1 %2139, %v26_v0   ;;  %55 = vperm.xlu0 %2138, %v24_v1   ;;  %v2153_v5 = vld [vmem:[%s2900_s1 + $0x40] sm:$0xff]   ;;  %v2157_v9 = vld [vmem:[%s2900_s1 + $0x50] sm:$0xff]  }
   0x3   :  { %v2154_v6 = vld [vmem:[%s2900_s1] sm:$0xff]   ;;  %1885 = vmatprep.subr.bf16.mxu0 %v2153_v5  ;;  %v2155_v7 = vld [vmem:[%s2900_s1 + $0x48] sm:$0xff]   ;;  %v2158_v10 = vld [vmem:[%s2900_s1 + $0x10] sm:$0xff]  }
   0x4   :  { %1886 = vmatpush3.bf16.msra.mxu0 %v2154_v6  ;;  %v2156_v8 = vld [vmem:[%s2900_s1 + $0x8] sm:$0xff]   ;;  %v2159_v11 = vld [vmem:[%s2900_s1 + $0x58] sm:$0xff]   ;;  %v2161_v13 = vld [vmem:[%s2900_s1 + $0xc0] sm:$0xff]  }
   0x5   :  { %1887 = vmatprep.subr.bf16.mxu0 %v2155_v7  ;;  %v2160_v14 = vld [vmem:[%s2900_s1 + $0x18] sm:$0xff]   ;;  %1919 = vmatprep.subr.bf16.mxu1 %v2161_v13  ;;  %v2163_v15 = vld [vmem:[%s2900_s1 + $0x80] sm:$0xff]   ;;  %v2165_v18 = vld [vmem:[%s2900_s1 + $0xc8] sm:$0xff]  }
   0x6   :  { %70 = vperm.xlu1 %2139, %v27_v3   ;;  %60 = vperm.xlu0 %2138, %v25_v4   ;;  %v2162_v16 = vld [vmem:[%s2900_s1 + $0x60] sm:$0xff]   ;;  %v2167_v20 = vld [vmem:[%s2900_s1 + $0x88] sm:$0xff]   ;;  %v2169_v22 = vld [vmem:[%s2900_s1 + $0xd0] sm:$0xff]  }
   0x7   :  { %v28_v17 = vld [vmem:[%s2902_s3 + $0x20] sm:$0xf]  ;;  %1920 = vmatpush3.bf16.msra.mxu1 %v2163_v15  ;;  %v2166_v21 = vld [vmem:[%s2900_s1 + $0x68] sm:$0xff]   ;;  %v2171_v24 = vld [vmem:[%s2900_s1 + $0x90] sm:$0xff]  }
   0x8   :  { %1888 = vmatpush3.bf16.msra.mxu0 %v2156_v8  ;;  %v2164_v19 = vld [vmem:[%s2900_s1 + $0x20] sm:$0xff]   ;;  %1921 = vmatprep.subr.bf16.mxu1 %v2165_v18  ;;  %v2168_v23 = vld [vmem:[%s2900_s1 + $0x28] sm:$0xff]   ;;  %v21_v26 = vld [vmem:[%s2899_s0 + $0x10] sm:$0xff] }
   0x9   :  { %1889 = vmatprep.subr.bf16.mxu0 %v2157_v9  ;;  %v20_v25 = vld [vmem:[%s2899_s0 + $0x8] sm:$0xff]  ;;  %v19_v28 = vld [vmem:[%s2899_s0] sm:$0xff]  ;;  %v2170_v29 = vld [vmem:[%s2900_s1 + $0x70] sm:$0xff]   ;;  %v38_v30 = vrot.slane %v21_v26, 1 }
   0xa   :  { %2141 = vset.pattern.permute.xlu1 %v2288_v12  ;;  %2140 = vset.pattern.permute.xlu0 %v2288_v12  ;;  %v36_v27 = vrot.slane %v20_v25, 1  ;;  %v35_v31 = vrot.slane %v19_v28, 1  ;;  %v2173_v32 = vld [vmem:[%s2900_s1 + $0xd8] sm:$0xff]   ;;  %v2172_v35 = vld [vmem:[%s2900_s1 + $0x30] sm:$0xff]   ;;  %v23_v41 = vld [vmem:[%s2899_s0 + $0x20] sm:$0xf] }
   0xb   :  { %94 = vperm.xlu1 %2141, %v25_v4   ;;  %90 = vperm.xlu0 %2140, %v24_v1   ;;  %v2175_v36 = vld [vmem:[%s2900_s1 + $0x98] sm:$0xff]   ;;  %v42_v43 = vrot.slane %v23_v41, 1  ;;  %v2177_v45 = vld [vmem:[%s2900_s1 + $0xe0] sm:$0xff]   ;;  %v2181_v57 = vld [vmem:[%s2900_s1 + $0xe8] sm:$0xff]  }
   0xc   :  { %1890 = vmatpush3.bf16.msra.mxu0 %v2158_v10  ;;  %1922 = vmatpush3.bf16.msra.mxu1 %v2167_v20  ;;  %v2403_v33 = vsel %vm34_vm0, %v35_v31, %v36_v27  ;;  %v2406_v34 = vsel %vm34_vm0, 0.0, %v35_v31  ;;  %v22_v37 = vld [vmem:[%s2899_s0 + $0x18] sm:$0xff]  ;;  %v2420_v39 = vsel %vm34_vm0, %v36_v27, %v38_v30  ;;  %v2178_v51 = vld [vmem:[%s2900_s1 + $0xa0] sm:$0xff]   ;;  %v2182_v60 = vld [vmem:[%s2900_s1 + $0xa8] sm:$0xff]  }
   0xd   :  { %1891 = vmatprep.subr.bf16.mxu0 %v2159_v11  ;;  %1923 = vmatprep.subr.bf16.mxu1 %v2169_v22  ;;  %v86_v38 = vpack.c.bf16 %v2403_v33, %v2406_v34  ;;  %v2174_v40 = vld [vmem:[%s2900_s1 + $0x78] sm:$0xff]   ;;  %v40_v42 = vrot.slane %v22_v37, 1  ;;  %v2179_v53 = vld [vmem:[%s2900_s1 + $0x140] sm:$0xff]   ;;  %v2185_v4 = vld [vmem:[%s2900_s1 + $0xf0] sm:$0xff]   ;;  %v2476_v12 = vsel %vm51_vm2, %v42_v43, 0.0 }
   0xe   :  { %v2176_v44 = vld [vmem:[%s2900_s1 + $0x38] sm:$0xff]   ;;  %v2186_v7 = vld [vmem:[%s2900_s1 + $0xb0] sm:$0xff]   ;;  %v2193_v13 = vld [vmem:[%s2900_s1 + $0x1c0] sm:$0xff]  }
   0xf   :  { %98 = vperm.xlu1 %2141, %v26_v0   ;;  %102 = vperm.xlu0 %2140, %v27_v3   ;;  %v2435_v46 = vsel %vm34_vm0, %v38_v30, %v40_v42  ;;  %v218_v47 = vshrl.u32 %v86_v38, 16  ;;  %v220_v48 = vshll.u32 %v86_v38, 16  ;;  %v2438_v49 = vsel %vm34_vm0, %v40_v42, %v42_v43  ;;  %v2189_v8 = vld [vmem:[%s2900_s1 + $0xf8] sm:$0xff]  }
  0x10   :  { %1892 = vmatpush3.bf16.msra.mxu0 %v2160_v14  ;;  %1924 = vmatpush3.bf16.msra.mxu1 %v2171_v24  ;;  %v87_v50 = vpack.c.bf16 %v2435_v46, %v2420_v39  ;;  %v2450_v54 = vpack.c.bf16 %v2438_v49, %v2438_v49  ;;  %v2190_v9 = vld [vmem:[%s2900_s1 + $0xb8] sm:$0xff]   ;;  %v157_v14 = vpack.c.bf16 %v2476_v12, %v2438_v49 }
  0x11   :  { %1893 = vmatprep.subr.bf16.mxu0 %v2162_v16  ;;  %1925 = vmatprep.subr.bf16.mxu1 %v2173_v32  ;;  %v222_v52 = vrot.slane %v220_v48, 1  ;;  %v268_v63 = vrot.slane %v218_v47, 3  ;;  %v269_v1 = vrot.slane %v220_v48, 4 }
  0x12   :  { %v225_v55 = vshll.u32 %v87_v50, 16  ;;  %v229_v58 = vshrl.u32 %v87_v50, 16  ;;  %v233_v61 = vshll.u32 %v2450_v54, 16  ;;  %v276_v15 = vshrl.u32 %v157_v14, 16 }
  0x13   :  { %2142 = vset.pattern.permute.xlu1 %v2287_v2  ;;  %106 = vperm.xlu0 %2140, %v28_v17   ;;  %v223_v56 = vor.u32 %v222_v52, %v218_v47  ;;  %v270_v10 = vor.u32 %v269_v1, %v268_v63  ;;  %v279_v16 = vshll.u32 %v157_v14, 16 }
  0x14   :  { %75 = vperm.xlu1 %2142, %v28_v17   ;;  %1894 = vmatpush3.bf16.msra.mxu0 %v2164_v19  ;;  %v227_v59 = vrot.slane %v225_v55, 1  ;;  %v2460_v2 = vrot.slane %v233_v61, 1  ;;  %v272_v3 = vrot.slane %v225_v55, 4  ;;  %v271_v6 = vrot.slane %v229_v58, 3 }
  0x15   :  { %1895 = vmatprep.subr.bf16.mxu0 %v2166_v21  ;;  %1926 = vmatpush3.bf16.msra.mxu1 %v2175_v36  ;;  %v278_v17 = vrot.slane %v276_v15, 3  ;;  %v281_v18 = vrot.slane %v279_v16, 4 }
  0x16   :  { %1927 = vmatprep.subr.bf16.mxu1 %v2177_v45  ;;  %v228_v62 = vsel %vm216_vm1, %v223_v56, %v227_v59  ;;  %v231_v0 = vor.u32 %v229_v58, %v227_v59  ;;  %v273_v11 = vor.u32 %v272_v3, %v271_v6 }
  0x17   :  { %953 = vmatprep.mubr.bf16.mxu0 %v228_v62  ;;  %v2483_v19 = vor.u32 %v281_v18, %v278_v17 }
  0x18   :  { %1896 = vmatpush3.bf16.msra.mxu0 %v2168_v23  ;;  %v236_v5 = vsel %vm216_vm1, %v231_v0, %v2460_v2  ;;  %v2485_v20 = vsel %vm267_vm3, %v270_v10, %v273_v11 }
  0x19   :  { %1897 = vmatprep.subr.bf16.mxu0 %v2170_v29  ;;  %1928 = vmatpush3.bf16.msra.mxu1 %v2178_v51  ;;  %v2488_v21 = vsel %vm267_vm3, %v273_v11, %v2483_v19 }
  0x1a   :  { %1929 = vmatprep.subr.bf16.mxu1 %v2181_v57 }
  0x1c   :  { %1898 = vmatpush3.bf16.msra.mxu0 %v2172_v35 }
  0x1d   :  { %1899 = vmatprep.subr.bf16.mxu0 %v2174_v40  ;;  %1930 = vmatpush3.bf16.msra.mxu1 %v2182_v60 }
  0x1e   :  { %1931 = vmatprep.subr.bf16.mxu1 %v2185_v4 }
  0x20   :  { %1900 = vmatpush3.bf16.msra.mxu0 %v2176_v44 }
  0x21   :  { %1953 = vmatprep.subr.bf16.mxu0 %v2179_v53  ;;  %1932 = vmatpush3.bf16.msra.mxu1 %v2186_v7 }
  0x22   :  { %1933 = vmatprep.subr.bf16.mxu1 %v2189_v8 }
  0x25   :  { %1934 = vmatpush3.bf16.msra.mxu1 %v2190_v9 }
  0x26   :  { %1987 = vmatprep.subr.bf16.mxu1 %v2193_v13 }
  0x27   :  { %9 = vsyncpa [#allocation3], 0  ;;  %vm132_vm4 = vcmask 1045504   ;;  %v2180_v32 = vld [vmem:[%s2900_s1 + $0x100] sm:$0xff]   ;;  %v2183_v36 = vld [vmem:[%s2900_s1 + $0x148] sm:$0xff]   ;;  %vm109_vm5 = vcmask 1041408  }
  0x28   :  { %v2184_v48 = vld [vmem:[%s2900_s1 + $0x108] sm:$0xff]   ;;  %v237_v50 = vshrl.u32 %v2450_v54, 16  ;;  %v2187_v56 = vld [vmem:[%s2900_s1 + $0x150] sm:$0xff]   ;;  %vm258_vm6 = vcmask 1044480   ;;  %v2191_v4 = vld [vmem:[%s2900_s1 + $0x158] sm:$0xff]   ;;  %vm166_vm8 = vcmask 1043456  }
  0x29   :  { %v2188_v62 = vld [vmem:[%s2900_s1 + $0x110] sm:$0xff]   ;;  %v2194_v18 = vld [vmem:[%s2900_s1 + $0x160] sm:$0xff]   ;;  %vm299_vm7 = vsmask.f32 5376  ;;  %vm2290_vm9 = vmmov 0   ;;  %s2291_s26 = smov 64  }
  0x2a   :  { %v239_v63 = vor.u32 %v237_v50, %v2460_v2  ;;  %v2197_v50 = vld [vmem:[%s2900_s1 + $0x1c8] sm:$0xff]   ;;  %vm1270_vm10 = vcmask 523264   ;;  %vm1710_vm11 = vcmask 261120   ;;  %s2292_s17 = smov [#allocation2]   ;;  %vm1756_vm12 = vcmask 8192  }
  0x2b   :  { %s1764_s18 = sshll.u32 %s2292_s17, 4  ;;  %s1765_s18 = int_to_ptr.vmem [resolvable:$true] %s1764_s18 }
  0x2c   :  { %s2267_s19 = scalar_lea.vmem %s1765_s18, 32  ;;  %p2268_p1 = scmp.lt.s32.totalorder %s1765_s18, %s1765_s18 }
  0x81   :  { %v2490_v22 = vpop.permute.xlu1 %65  ;;  %v2492_v23 = vpop.permute.xlu0 %55 }
  0x82   :  { %v136_v24 = vrot.slane %v2490_v22, 2  ;;  %v78_v27 = vmul.f32 %v2492_v23, %v2406_v34  ;;  %v133_v30 = vrot.slane %v2492_v23, 2  ;;  %v80_v51 = vmul.f32 %v2490_v22, %v2420_v39 }
  0x84   :  { %v148_v44 = vmul.f32 %v133_v30, %v2406_v34 }
  0x85   :  { %v2495_v25 = vpop.permute.xlu1 %70  ;;  %v2497_v26 = vpop.permute.xlu0 %60 }
  0x86   :  { %v138_v28 = vrot.slane %v2495_v25, 2  ;;  %v79_v29 = vmul.f32 %v2497_v26, %v2403_v33  ;;  %v134_v31 = vrot.slane %v2497_v26, 2  ;;  %v81_v52 = vmul.f32 %v2495_v25, %v2435_v46 }
  0x88   :  { %v83_v35 = vpack.c.bf16 %v79_v29, %v78_v27  ;;  %v135_v37 = vsel %vm132_vm4, %v133_v30, %v134_v31  ;;  %v139_v38 = vsel %vm132_vm4, %v136_v24, %v138_v28  ;;  %v137_v42 = vsel %vm132_vm4, %v134_v31, %v136_v24 }
  0x89   :  { %v149_v43 = vmul.f32 %v135_v37, %v2403_v33  ;;  %v150_v53 = vmul.f32 %v137_v42, %v2420_v39  ;;  %v151_v55 = vmul.f32 %v139_v38, %v2435_v46  ;;  %v84_v3 = vpack.c.bf16 %v81_v52, %v80_v51  ;;  %v2196_v38 = vld [vmem:[%s2900_s1 + $0x120] sm:$0xff]   ;;  %v2198_v42 = vld [vmem:[%s2900_s1 + $0x168] sm:$0xff]  }
  0x8a   :  { %v2516_v40 = vpop.permute.xlu1 %94  ;;  %v2518_v41 = vpop.permute.xlu0 %90  ;;  %954 = vmatmul.mubr.bf16.vlgmr.msra.gmra.mrb[0].mxu0 %v83_v35  ;;  %v190_v52 = vpack.c.bf16 %v2438_v49, %v2435_v46 }
  0x8b   :  { %v111_v45 = vrot.slane %v2516_v40, 6  ;;  %v110_v47 = vrot.slane %v2518_v41, 6  ;;  %1954 = vmatpush3.bf16.msra.mxu0 %v2180_v32  ;;  %961 = vmatprep.mubr.bf16.mxu0 %v236_v5  ;;  %v154_v57 = vpack.c.bf16 %v149_v43, %v148_v44  ;;  %v155_v60 = vpack.c.bf16 %v151_v55, %v150_v53  ;;  %v2200_v55 = vld [vmem:[%s2900_s1 + $0x128] sm:$0xff]  }
  0x8c   :  { %1955 = vmatprep.subr.bf16.mxu0 %v2183_v36  ;;  %v159_v15 = vmul.f32 %v2516_v40, %v2420_v39  ;;  %v158_v24 = vmul.f32 %v2518_v41, %v2403_v33 }
  0x8d   :  { %v112_v58 = vsel %vm109_vm5, %v110_v47, %v111_v45  ;;  %v259_v1 = vrot.slane %v154_v57, 3  ;;  %v124_v5 = vmul.f32 %v110_v47, %v2406_v34  ;;  %v260_v7 = vrot.slane %v155_v60, 3  ;;  %v2192_v34 = vld [vmem:[%s2900_s1 + $0x118] sm:$0xff]   ;;  %v2199_v60 = vld [vmem:[%s2900_s1 + $0x188] sm:$0xff]  }
  0x8e   :  { %v2539_v59 = vpop.permute.xlu1 %98  ;;  %v2541_v54 = vpop.permute.xlu0 %102  ;;  %v125_v8 = vmul.f32 %v112_v58, %v2403_v33  ;;  %v163_v47 = vpack.c.bf16 %v159_v15, %v158_v24  ;;  %v2202_v58 = vld [vmem:[%s2900_s1 + $0x170] sm:$0xff]   ;;  %v2208_v15 = vld [vmem:[%s2900_s1 + $0x138] sm:$0xff]   ;;  %v2209_v24 = vld [vmem:[%s2900_s1 + $0x1e0] sm:$0xff]  }
  0x8f   :  { %v113_v61 = vrot.slane %v2539_v59, 6  ;;  %1956 = vmatpush3.bf16.msra.mxu0 %v2184_v48  ;;  %v115_v0 = vrot.slane %v2541_v54, 6  ;;  %v261_v10 = vsel %vm258_vm6, %v259_v1, %v260_v7  ;;  %v189_v48 = vpack.c.bf16 %v2420_v39, %v2403_v33 }
  0x90   :  { %1957 = vmatprep.subr.bf16.mxu0 %v2187_v56  ;;  %1009 = vmatprep.mubr.bf16.mxu1 %v261_v10  ;;  %v129_v30 = vpack.c.bf16 %v125_v8, %v124_v5  ;;  %v309_v1 = vshrl.u32 %v190_v52, 16  ;;  %v2204_v5 = vld [vmem:[%s2900_s1 + $0x130] sm:$0xff]   ;;  %v2205_v8 = vld [vmem:[%s2900_s1 + $0x1d8] sm:$0xff]  }
  0x91   :  { %v114_v6 = vsel %vm109_vm5, %v111_v45, %v113_v61  ;;  %v116_v9 = vsel %vm109_vm5, %v113_v61, %v115_v0  ;;  %v2195_v45 = vld [vmem:[%s2900_s1 + $0x180] sm:$0xff]   ;;  %v301_v61 = vshrl.u32 %v189_v48, 16 }
  0x92   :  { %962 = vmatmul.mubr.bf16.gmra.mrb[4].mxu0 %v84_v3  ;;  %v2556_v2 = vpop.permute.xlu0 %106  ;;  %v126_v14 = vmul.f32 %v114_v6, %v2420_v39  ;;  %v127_v29 = vmul.f32 %v116_v9, %v2435_v46  ;;  %v247_v37 = vrot.slane %v129_v30, 1  ;;  %v312_v3 = vshll.u32 %v190_v52, 16  ;;  %v2206_v6 = vld [vmem:[%s2900_s1 + $0x178] sm:$0xff]   ;;  %v2211_v30 = vld [vmem:[%s2900_s1 + $0x200] sm:$0xff]  }
  0x93   :  { %1958 = vmatpush3.bf16.msra.mxu0 %v2188_v62  ;;  %v2559_v11 = vpop.permute.xlu1 %75  ;;  %v117_v13 = vrot.slane %v2556_v2, 6  ;;  %969 = vmatprep.mubr.bf16.mxu0 %v239_v63  ;;  %v2201_v63 = vld [vmem:[%s2900_s1 + $0x1d0] sm:$0xff]   ;;  %v303_v9 = vrot.slane %v301_v61, 2 }
  0x94   :  { %v82_v16 = vmul.f32 %v2559_v11, %v2438_v49  ;;  %v140_v17 = vrot.slane %v2559_v11, 2  ;;  %1959 = vmatprep.subr.bf16.mxu0 %v2191_v4  ;;  %v130_v36 = vpack.c.bf16 %v127_v29, %v126_v14 }
  0x95   :  { %v118_v27 = vsel %vm109_vm5, %v115_v0, %v117_v13  ;;  %v304_v0 = vshll.u32 %v189_v48, 16  ;;  %v311_v13 = vrot.slane %v309_v1, 2 }
  0x96   :  { %v141_v31 = vsel %vm132_vm4, %v138_v28, %v140_v17  ;;  %v153_v32 = vmul.f32 %v140_v17, %v2476_v12  ;;  %v85_v35 = vpack.c.bf16 %v82_v16, %v82_v16  ;;  %v128_v44 = vmul.f32 %v118_v27, %v2438_v49 }
  0x97   :  { %1960 = vmatpush3.bf16.msra.mxu0 %v2192_v34  ;;  %v152_v43 = vmul.f32 %v141_v31, %v2438_v49  ;;  %v248_v28 = vrot.slane %v130_v36, 1  ;;  %v306_v10 = vrot.slane %v304_v0, 3  ;;  %v314_v34 = vrot.slane %v312_v3, 3 }
  0x98   :  { %1961 = vmatprep.subr.bf16.mxu0 %v2194_v18  ;;  %v131_v56 = vpack.c.bf16 %v128_v44, %v128_v44  ;;  %v160_v16 = vmul.f32 %v2539_v59, %v2435_v46  ;;  %v161_v17 = vmul.f32 %v2541_v54, %v2438_v49  ;;  %v2207_v18 = vld [vmem:[%s2900_s1 + $0x198] sm:$0xff]   ;;  %v170_v31 = vrot.slane %v2490_v22, 4  ;;  %v2212_v22 = vld [vmem:[%s2900_s1 + $0x1e8] sm:$0xff]  }
  0x99   :  { %v156_v51 = vpack.c.bf16 %v153_v32, %v152_v43  ;;  %v249_v53 = vsel %vm34_vm0, %v247_v37, %v248_v28  ;;  %v307_v27 = vor.u32 %v306_v10, %v303_v9  ;;  %v2640_v29 = vor.u32 %v314_v34, %v311_v13  ;;  %v2210_v37 = vld [vmem:[%s2900_s1 + $0x1a0] sm:$0xff]  }
  0x9a   :  { %970 = vmatmul.mubr.bf16.gmra.mrb[8].mxu0 %v85_v35  ;;  %1010 = vmatmul.mubr.bf16.vlgmr.msra.gmra.mrb[0].mxu1 %v249_v53  ;;  %v250_v4 = vrot.slane %v131_v56, 1  ;;  %v172_v32 = vrot.slane %v2495_v25, 4  ;;  %v168_v35 = vrot.slane %v2497_v26, 4  ;;  %v2289_v36 = vmov 0.0   ;;  %v2214_v26 = vld [vmem:[%s2900_s1 + $0x208] sm:$0xff]   ;;  %v2221_v13 = vld [vmem:[%s2900_s1 + $0x220] sm:$0xff]  }
  0x9b   :  { %1962 = vmatpush3.bf16.msra.mxu0 %v2196_v38  ;;  %1065 = vmatprep.mubr.bf16.mxu0 %v163_v47  ;;  %v262_v57 = vrot.slane %v156_v51, 3  ;;  %v164_v38 = vpack.c.bf16 %v161_v17, %v160_v16  ;;  %v167_v43 = vrot.slane %v2492_v23, 4  ;;  %v316_v25 = vsel %vm299_vm7, %v307_v27, %v2640_v29 }
  0x9c   :  { %1963 = vmatprep.subr.bf16.mxu0 %v2198_v42  ;;  %1988 = vmatpush3.bf16.msra.mxu1 %v2195_v45  ;;  %v251_v14 = vsel %vm34_vm0, %v248_v28, %v250_v4  ;;  %v191_v42 = vpack.c.bf16 %v2289_v36, %v2476_v12  ;;  %v173_v44 = vsel %vm166_vm8, %v170_v31, %v172_v32  ;;  %v2213_v45 = vld [vmem:[%s2900_s1 + $0x1a8] sm:$0xff]   ;;  %v174_v56 = vrot.slane %v2559_v11, 4  ;;  %v2220_v11 = vld [vmem:[%s2900_s1 + $0x218] sm:$0xff]  }
  0x9d   :  { %1989 = vmatprep.subr.bf16.mxu1 %v2197_v50  ;;  %v263_v62 = vsel %vm258_vm6, %v260_v7, %v262_v57  ;;  %v2203_v7 = vld [vmem:[%s2900_s1 + $0x190] sm:$0xff]   ;;  %v169_v23 = vsel %vm166_vm8, %v167_v43, %v168_v35  ;;  %v171_v28 = vsel %vm166_vm8, %v168_v35, %v170_v31  ;;  %v184_v51 = vmul.f32 %v173_v44, %v2438_v49  ;;  %v2231_v44 = vld [vmem:[%s2901_s2 + $0xc0] sm:$0xff]  }
  0x9e   :  { %1017 = vmatprep.mubr.bf16.mxu1 %v263_v62  ;;  %v318_v47 = vshrl.u32 %v191_v42, 16  ;;  %v321_v48 = vshll.u32 %v191_v42, 16  ;;  %v2215_v50 = vld [vmem:[%s2900_s1 + $0x1f0] sm:$0xff]   ;;  %v182_v52 = vmul.f32 %v169_v23, %v2420_v39  ;;  %v183_v53 = vmul.f32 %v171_v28, %v2435_v46  ;;  %v2232_v23 = vld [vmem:[%s2901_s2 + $0x80] sm:$0xff]   ;;  %v2228_v28 = vld [vmem:[%s2901_s2 + $0x8] sm:$0xff]  }
  0x9f   :  { %1964 = vmatpush3.bf16.msra.mxu0 %v2200_v55  ;;  %v2217_v55 = vld [vmem:[%s2900_s1 + $0x210] sm:$0xff]   ;;  %v175_v3 = vsel %vm166_vm8, %v172_v32, %v174_v56  ;;  %v199_v27 = vrot.slane %v2556_v2, 2  ;;  %v2237_v56 = vld [vmem:[%s2901_s2 + $0x60] sm:$0xff]  }
  0xa0   :  { %1965 = vmatprep.subr.bf16.mxu0 %v2202_v58  ;;  %1990 = vmatpush3.bf16.msra.mxu1 %v2199_v60  ;;  %v2216_v58 = vld [vmem:[%s2900_s1 + $0x1b0] sm:$0xff]   ;;  %v320_v61 = vrot.slane %v318_v47, 2  ;;  %v323_v62 = vrot.slane %v321_v48, 3  ;;  %v187_v1 = vpack.c.bf16 %v184_v51, %v183_v53  ;;  %v185_v34 = vmul.f32 %v175_v3, %v2476_v12  ;;  %v2236_v47 = vld [vmem:[%s2901_s2 + $0x88] sm:$0xff]   ;;  %v2233_v51 = vld [vmem:[%s2901_s2 + $0x58] sm:$0xff]  }
  0xa1   :  { %1991 = vmatprep.subr.bf16.mxu1 %v2201_v63  ;;  %v2218_v63 = vld [vmem:[%s2900_s1 + $0x1f8] sm:$0xff]   ;;  %v2239_v48 = vld [vmem:[%s2901_s2 + $0xd0] sm:$0xff]  }
  0xa2   :  { %1018 = vmatmul.mubr.bf16.gmra.mrb[4].mxu1 %v251_v14  ;;  %v292_v10 = vrot.slane %v187_v1, 2  ;;  %v188_v16 = vpack.c.bf16 %v185_v34, %v185_v34  ;;  %v2243_v53 = vld [vmem:[%s2901_s2 + $0xd8] sm:$0xff]  }
  0xa3   :  { %1966 = vmatpush3.bf16.msra.mxu0 %v2204_v5  ;;  %1025 = vmatprep.mubr.bf16.mxu1 %v262_v57  ;;  %v181_v57 = vmul.f32 %v167_v43, %v2403_v33  ;;  %v193_v5 = vrot.slane %v2516_v40, 2 }
  0xa4   :  { %1967 = vmatprep.subr.bf16.mxu0 %v2206_v6  ;;  %1992 = vmatpush3.bf16.msra.mxu1 %v2203_v7  ;;  %v192_v6 = vrot.slane %v2518_v41, 2  ;;  %v195_v7 = vrot.slane %v2539_v59, 2 }
  0xa5   :  { %1993 = vmatprep.subr.bf16.mxu1 %v2205_v8  ;;  %v186_v0 = vpack.c.bf16 %v182_v52, %v181_v57  ;;  %v197_v8 = vrot.slane %v2541_v54, 2  ;;  %v2240_v52 = vld [vmem:[%s2901_s2 + $0x90] sm:$0xff]   ;;  %v2244_v57 = vld [vmem:[%s2901_s2 + $0x98] sm:$0xff]  }
  0xa6   :  { %v194_v40 = vsel %vm132_vm4, %v192_v6, %v193_v5  ;;  %v196_v41 = vsel %vm132_vm4, %v193_v5, %v195_v7 }
  0xa7   :  { %1968 = vmatpush3.bf16.msra.mxu0 %v2208_v15  ;;  %v291_v9 = vrot.slane %v186_v0, 2  ;;  %v198_v59 = vsel %vm132_vm4, %v195_v7, %v197_v8  ;;  %v2222_v15 = vld [vmem:[%s2900_s1 + $0x228] sm:$0xff]   ;;  %v208_v17 = vmul.f32 %v194_v40, %v2420_v39  ;;  %v1772_v40 = vld [vmem:[%s2902_s3 + $0x24] ss:$0 sm:$0xff] }
  0xa8   :  { %2084 = vmatprep.subr.bf16.mxu0 %v2289_v36  ;;  %1994 = vmatpush3.bf16.msra.mxu1 %v2207_v18  ;;  %v209_v18 = vmul.f32 %v196_v41, %v2435_v46  ;;  %v2224_v46 = vld [vmem:[%s2900_s1 + $0x238] sm:$0xff]  }
  0xa9   :  { %1995 = vmatprep.subr.bf16.mxu1 %v2209_v24  ;;  %v293_v14 = vsel %vm132_vm4, %v291_v9, %v292_v10  ;;  %v210_v24 = vmul.f32 %v198_v59, %v2438_v49 }
  0xaa   :  { %1066 = vmatmul.mubr.bf16.vlgmr.msra.gmra.mrb[12].mxu0 %v2485_v20  ;;  %1026 = vmatmul.mubr.bf16.gmra.mrb[8].mxu1 %v250_v4  ;;  %v162_v20 = vmul.f32 %v2556_v2, %v2476_v12  ;;  %v324_v4 = vor.u32 %v323_v62, %v320_v61  ;;  %v212_v2 = vmul.f32 0.0, %v199_v27  ;;  %v2241_v61 = vld [vmem:[%s2901_s2 + $0x68] sm:$0xff]  }
  0xab   :  { %1073 = vmatprep.mubr.bf16.mxu0 %v164_v38  ;;  %2085 = vmatpush3.bf16.msra.mxu0 %v2211_v30  ;;  %v2223_v30 = vld [vmem:[%s2900_s1 + $0x230] sm:$0xff]   ;;  %v214_v32 = vpack.c.bf16 %v210_v24, %v209_v18  ;;  %v2242_v62 = vld [vmem:[%s2901_s2 + $0x28] sm:$0xff]  }
  0xac   :  { %2086 = vmatprep.subr.bf16.mxu0 %v2289_v36  ;;  %1996 = vmatpush3.bf16.msra.mxu1 %v2210_v37  ;;  %v165_v60 = vpack.c.bf16 %v162_v20, %v162_v20  ;;  %v325_v54 = vsel %vm299_vm7, %v2640_v29, %v324_v4  ;;  %v294_v29 = vrot.slane %v188_v16, 2  ;;  %v2235_v20 = vld [vmem:[%s2901_s2 + $0xc8] sm:$0xff]  }
  0xad   :  { %1121 = vmatprep.mubr.bf16.mxu1 %v316_v25  ;;  %1997 = vmatprep.subr.bf16.mxu1 %v2212_v22  ;;  %v333_v35 = vrot.slane %v214_v32, 3  ;;  %v2226_v25 = vld [vmem:[%s2901_s2] sm:$0xff]  }
  0xae   :  { %v295_v39 = vsel %vm132_vm4, %v292_v10, %v294_v29 }
  0xaf   :  { %2087 = vmatpush3.bf16.msra.mxu0 %v2214_v26  ;;  %v2227_v26 = vld [vmem:[%s2901_s2 + $0x48] sm:$0xff]  }
  0xb0   :  { %2088 = vmatprep.subr.bf16.mxu0 %v2289_v36  ;;  %1998 = vmatpush3.bf16.msra.mxu1 %v2213_v45  ;;  %v2229_v45 = vld [vmem:[%s2901_s2 + $0x50] sm:$0xff]  }
  0xb1   :  { %1999 = vmatprep.subr.bf16.mxu1 %v2215_v50  ;;  %v2230_v50 = vld [vmem:[%s2901_s2 + $0x10] sm:$0xff]  }
  0xb2   :  { %1074 = vmatmul.mubr.bf16.gmra.mrb[16].mxu0 %v2488_v21  ;;  %v2219_v21 = vld [vmem:[%s2900_s1 + $0x1b8] sm:$0xff]   ;;  %s2263_s1 = scalar_lea.vmem %s1765_s18, 16 }
  0xb3   :  { %1081 = vmatprep.mubr.bf16.mxu0 %v165_v60  ;;  %2089 = vmatpush3.bf16.msra.mxu0 %v2217_v55  ;;  %v2234_v55 = vld [vmem:[%s2901_s2 + $0x18] sm:$0xff]   ;;  %v2238_v60 = vld [vmem:[%s2901_s2 + $0x20] sm:$0xff]   ;;  %p2264_p0 = scmp.ne.s32.totalorder %s1765_s18, %s2263_s1  ;;  %p2269_p2 = scmp.lt.s32.totalorder %s2267_s19, %s2263_s1 }
  0xb4   :  { %2090 = vmatprep.subr.bf16.mxu0 %v2289_v36  ;;  %2000 = vmatpush3.bf16.msra.mxu1 %v2216_v58  ;;  %v2247_v58 = vld [vmem:[%s2901_s2 + $0xe0] sm:$0xff]  }
  0xb5   :  { %2001 = vmatprep.subr.bf16.mxu1 %v2218_v63  ;;  %v2245_v63 = vld [vmem:[%s2901_s2 + $0x70] sm:$0xff]   ;;  %p2270_p3 = por %p2269_p2, %p2268_p1 }
  0xb7   :  { %2091 = vmatpush3.bf16.msra.mxu0 %v2220_v11  ;;  %v2246_v11 = vld [vmem:[%s2901_s2 + $0x30] sm:$0xff]   ;;  %p2271_p4 = pnand %p2270_p3, %p2264_p0 }
  0xb8   :  { %2092 = vmatprep.subr.bf16.mxu0 %v2289_v36  ;;  %2002 = vmatpush3.bf16.msra.mxu1 %v2219_v21 }
  0xba   :  { %1082 = vmatmul.mubr.bf16.gmra.mrb[20].mxu0 %v2483_v19  ;;  %v207_v19 = vmul.f32 %v192_v6, %v2403_v33  ;;  %v200_v33 = vsel %vm132_vm4, %v197_v8, %v199_v27 }
  0xbb   :  { %2093 = vmatpush3.bf16.msra.mxu0 %v2221_v13  ;;  %2100 = vmatprep.mubr.msk.bf16.mxu0 %vm2290_vm9, %v2289_v36  ;;  %v211_v37 = vmul.f32 %v200_v33, %v2476_v12  ;;  %v2225_v12 = vld [vmem:[%s2901_s2 + $0x40] sm:$0xff]  }
  0xbc   :  { %1122 = vmatmul.mubr.bf16.vlgmr.msra.gmra.mrb[12].mxu1 %v293_v14  ;;  %2094 = vmatprep.subr.bf16.mxu0 %v2289_v36  ;;  %v213_v31 = vpack.c.bf16 %v208_v17, %v207_v19 }
  0xbd   :  { %1129 = vmatprep.mubr.bf16.mxu1 %v325_v54  ;;  %v215_v42 = vpack.c.bf16 %v212_v2, %v211_v37  ;;  %2032 = vmatprep.subr.bf16.mxu1 %v2225_v12 }
  0xbe   :  { %v332_v49 = vrot.slane %v213_v31, 3  ;;  %2033 = vmatpush3.bf16.msra.mxu1 %v2226_v25 }
  0xbf   :  { %2095 = vmatpush3.bf16.msra.mxu0 %v2222_v15  ;;  %v335_v43 = vrot.slane %v215_v42, 3  ;;  %2034 = vmatprep.subr.bf16.mxu1 %v2227_v26 }
  0xc0   :  { %2096 = vmatprep.subr.bf16.mxu0 %v2289_v36  ;;  %v334_v38 = vsel %vm258_vm6, %v332_v49, %v333_v35 }
  0xc1   :  { %v336_v22 = vsel %vm258_vm6, %v333_v35, %v335_v43 }
  0xc2   :  { %2035 = vmatpush3.bf16.msra.mxu1 %v2228_v28 }
  0xc3   :  { %2097 = vmatpush3.bf16.msra.mxu0 %v2223_v30  ;;  %2036 = vmatprep.subr.bf16.mxu1 %v2229_v45 }
  0xc4   :  { %1130 = vmatmul.mubr.bf16.gmra.mrb[16].mxu1 %v295_v39  ;;  %2098 = vmatprep.subr.bf16.mxu0 %v2289_v36 }
  0xc5   :  { %1137 = vmatprep.mubr.bf16.mxu1 %v324_v4 }
  0xc6   :  { %2037 = vmatpush3.bf16.msra.mxu1 %v2230_v50 }
  0xc7   :  { %2099 = vmatpush3.bf16.msra.mxu0 %v2224_v46  ;;  %2038 = vmatprep.subr.bf16.mxu1 %v2233_v51 }
  0xc8   :  { %2054 = vmatprep.subr.bf16.mxu0 %v2231_v44 }
  0xca   :  { %2101 = vmatmul.mubr.bf16.vlgmr.msra.gmra.mrb[24].mxu0 %v334_v38  ;;  %2039 = vmatpush3.bf16.msra.mxu1 %v2234_v55 }
  0xcb   :  { %2104 = vmatprep.mubr.msk.bf16.mxu0 %vm2290_vm9, %v2289_v36  ;;  %2055 = vmatpush3.bf16.msra.mxu0 %v2232_v23 }
  0xcc   :  { %1138 = vmatmul.mubr.bf16.gmra.mrb[20].mxu1 %v294_v29  ;;  %2056 = vmatprep.subr.bf16.mxu0 %v2235_v20 }
  0xcd   :  { %2040 = vmatprep.subr.bf16.mxu1 %v2237_v56 }
  0xce   :  { %2041 = vmatpush3.bf16.msra.mxu1 %v2238_v60 }
  0xcf   :  { %2057 = vmatpush3.bf16.msra.mxu0 %v2236_v47  ;;  %2042 = vmatprep.subr.bf16.mxu1 %v2241_v61 }
  0xd0   :  { %2058 = vmatprep.subr.bf16.mxu0 %v2239_v48 }
  0xd2   :  { %2105 = vmatmul.mubr.bf16.gmra.mrb[28].mxu0 %v336_v22  ;;  %2043 = vmatpush3.bf16.msra.mxu1 %v2242_v62 }
  0xd3   :  { %2108 = vmatprep.mubr.msk.bf16.mxu0 %vm2290_vm9, %v2289_v36  ;;  %2059 = vmatpush3.bf16.msra.mxu0 %v2240_v52 }
  0xd4   :  { %2060 = vmatprep.subr.bf16.mxu0 %v2243_v53  ;;  %2044 = vmatprep.subr.bf16.mxu1 %v2245_v63 }
  0xd6   :  { %2045 = vmatpush3.bf16.msra.mxu1 %v2246_v11 }
  0xd7   :  { %2061 = vmatpush3.bf16.msra.mxu0 %v2244_v57 }
  0xd8   :  { %2062 = vmatprep.subr.bf16.mxu0 %v2247_v58 }
  0xda   :  { %2109 = vmatmul.mubr.bf16.gmra.mrb[32].mxu0 %v335_v43 }
 0x15d   :  { %v1901_v0 = vpop.f32.mrb[0].mxu0 }
 0x15e   :  { %v1902_v1 = vpop.f32.mrb[1].mxu0 }
 0x15f   :  { %v1903_v3 = vadd.f32 %v1902_v1, %v1901_v0  ;;  %v1904_v21 = vpop.f32.mrb[2].mxu0 }
 0x160   :  { %v1905_v4 = vpop.f32.mrb[3].mxu0 }
 0x161   :  { %v1906_v5 = vadd.f32 %v1905_v4, %v1904_v21  ;;  %v956_v19 = vadd.f32 %v1903_v3, %v1772_v40 }
 0x163   :  { %v959_v27 = vadd.f32 %v1906_v5, %v1772_v40 }
 0x165   :  { %v1907_v6 = vpop.f32.mrb[4].mxu0 }
 0x166   :  { %v1908_v7 = vpop.f32.mrb[5].mxu0 }
 0x167   :  { %v1909_v8 = vadd.f32 %v1908_v7, %v1907_v6  ;;  %v1910_v9 = vpop.f32.mrb[6].mxu0 }
 0x168   :  { %v1911_v10 = vpop.f32.mrb[7].mxu0 }
 0x169   :  { %v1912_v13 = vadd.f32 %v1911_v10, %v1910_v9  ;;  %v964_v39 = vadd.f32 %v1909_v8, %v1772_v40 }
 0x16b   :  { %v967_v35 = vadd.f32 %v1912_v13, %v1772_v40 }
 0x16d   :  { %v1913_v34 = vpop.f32.mrb[8].mxu0  ;;  %v1935_v59 = vpop.f32.mrb[0].mxu1 }
 0x16e   :  { %v1914_v41 = vpop.f32.mrb[9].mxu0  ;;  %v1936_v15 = vpop.f32.mrb[1].mxu1 }
 0x16f   :  { %v1915_v54 = vadd.f32 %v1914_v41, %v1913_v34  ;;  %v1916_v14 = vpop.f32.mrb[10].mxu0  ;;  %v1937_v17 = vadd.f32 %v1936_v15, %v1935_v59  ;;  %v1938_v18 = vpop.f32.mrb[2].mxu1 }
 0x170   :  { %v1917_v16 = vpop.f32.mrb[11].mxu0  ;;  %v1939_v24 = vpop.f32.mrb[3].mxu1 }
 0x171   :  { %v1012_v29 = vadd.f32 %v1937_v17, %v956_v19  ;;  %v1940_v30 = vadd.f32 %v1939_v24, %v1938_v18  ;;  %v972_v28 = vadd.f32 %v1915_v54, %v1772_v40 }
 0x173   :  { %v1015_v31 = vadd.f32 %v1940_v30, %v959_v27 }
 0x175   :  { %v1941_v32 = vpop.f32.mrb[4].mxu1 }
 0x176   :  { %v1942_v33 = vpop.f32.mrb[5].mxu1 }
 0x177   :  { %v1943_v46 = vadd.f32 %v1942_v33, %v1941_v32  ;;  %v1944_v49 = vpop.f32.mrb[6].mxu1 }
 0x178   :  { %v1945_v2 = vpop.f32.mrb[7].mxu1 }
 0x179   :  { %v1020_v37 = vadd.f32 %v1943_v46, %v964_v39  ;;  %v1946_v38 = vadd.f32 %v1945_v2, %v1944_v49 }
 0x17b   :  { %v1023_v42 = vadd.f32 %v1946_v38, %v967_v35 }
 0x17d   :  { %v1969_v43 = vpop.f32.mrb[12].mxu0  ;;  %v1947_v12 = vpop.f32.mrb[8].mxu1 }
 0x17e   :  { %v1970_v22 = vpop.f32.mrb[13].mxu0  ;;  %v1948_v44 = vpop.f32.mrb[9].mxu1 }
 0x17f   :  { %v1971_v25 = vadd.f32 %v1970_v22, %v1969_v43  ;;  %v1972_v26 = vpop.f32.mrb[14].mxu0  ;;  %v1949_v20 = vadd.f32 %v1948_v44, %v1947_v12  ;;  %v1950_v47 = vpop.f32.mrb[10].mxu1 }
 0x180   :  { %v1973_v23 = vpop.f32.mrb[15].mxu0  ;;  %v1951_v50 = vpop.f32.mrb[11].mxu1 }
 0x181   :  { %v1068_v45 = vadd.f32 %v1971_v25, %v1012_v29  ;;  %v1974_v48 = vadd.f32 %v1973_v23, %v1972_v26  ;;  %v1028_v51 = vadd.f32 %v1949_v20, %v972_v28 }
 0x183   :  { %v1071_v52 = vadd.f32 %v1974_v48, %v1015_v31 }
 0x185   :  { %v1975_v53 = vpop.f32.mrb[16].mxu0 }
 0x186   :  { %v1976_v55 = vpop.f32.mrb[17].mxu0 }
 0x187   :  { %v1977_v56 = vadd.f32 %v1976_v55, %v1975_v53  ;;  %v1978_v57 = vpop.f32.mrb[18].mxu0 }
 0x188   :  { %v1979_v58 = vpop.f32.mrb[19].mxu0 }
 0x189   :  { %v1076_v60 = vadd.f32 %v1977_v56, %v1020_v37  ;;  %v1980_v61 = vadd.f32 %v1979_v58, %v1978_v57  ;;  %v2248_v56 = vld [vmem:[%s2901_s2 + $0xa0] sm:$0xff]   ;;  %v2249_v57 = vld [vmem:[%s2901_s2 + $0x78] sm:$0xff]  }
 0x18a   :  { %v2250_v58 = vld [vmem:[%s2901_s2 + $0x38] sm:$0xff]   ;;  %2063 = vmatpush3.bf16.msra.mxu0 %v2248_v56  ;;  %2046 = vmatprep.subr.bf16.mxu1 %v2249_v57 }
 0x18b   :  { %v1079_v62 = vadd.f32 %v1980_v61, %v1023_v42  ;;  %2047 = vmatpush3.bf16.msra.mxu1 %v2250_v58 }
 0x18c   :  { %2112 = vmatprep.subr.bf16.mxu1 %v2289_v36 }
 0x18d   :  { %v1981_v63 = vpop.f32.mrb[20].mxu0 }
 0x18e   :  { %v1982_v11 = vpop.f32.mrb[21].mxu0 }
 0x18f   :  { %v2003_v0 = vpop.f32.mrb[12].mxu1  ;;  %v1983_v1 = vadd.f32 %v1982_v11, %v1981_v63  ;;  %v1984_v3 = vpop.f32.mrb[22].mxu0  ;;  %v2251_v11 = vld [vmem:[%s2901_s2 + $0xe8] sm:$0xff]  }
 0x190   :  { %v2004_v21 = vpop.f32.mrb[13].mxu1  ;;  %v1985_v4 = vpop.f32.mrb[23].mxu0  ;;  %2064 = vmatprep.subr.bf16.mxu0 %v2251_v11 }
 0x191   :  { %v2005_v5 = vadd.f32 %v2004_v21, %v2003_v0  ;;  %v1084_v6 = vadd.f32 %v1983_v1, %v1028_v51  ;;  %v2006_v7 = vpop.f32.mrb[14].mxu1  ;;  %v2252_v1 = vld [vmem:[%s2901_s2 + $0xa8] sm:$0xff]  }
 0x192   :  { %v2007_v8 = vpop.f32.mrb[15].mxu1  ;;  %2065 = vmatpush3.bf16.msra.mxu0 %v2252_v1 }
 0x193   :  { %v2008_v9 = vadd.f32 %v2007_v8, %v2006_v7  ;;  %v1124_v10 = vadd.f32 %v2005_v5, %v1068_v45  ;;  %v2254_v5 = vld [vmem:[%s2901_s2 + $0xf0] sm:$0xff]  }
 0x194   :  { %2066 = vmatprep.subr.bf16.mxu0 %v2254_v5 }
 0x195   :  { %v1127_v13 = vadd.f32 %v2008_v9, %v1071_v52 }
 0x197   :  { %v2009_v34 = vpop.f32.mrb[16].mxu1 }
 0x198   :  { %v2010_v40 = vpop.f32.mrb[17].mxu1 }
 0x199   :  { %v2011_v41 = vadd.f32 %v2010_v40, %v2009_v34  ;;  %v2012_v59 = vpop.f32.mrb[18].mxu1  ;;  %v2257_v40 = vld [vmem:[%s2901_s2 + $0xf8] sm:$0xff]  }
 0x19a   :  { %v2013_v54 = vpop.f32.mrb[19].mxu1 }
 0x19b   :  { %v2014_v14 = vadd.f32 %v2013_v54, %v2012_v59  ;;  %v1132_v15 = vadd.f32 %v2011_v41, %v1076_v60  ;;  %v2258_v59 = vld [vmem:[%s2901_s2 + $0xb8] sm:$0xff]  }
 0x19d   :  { %v1179_v16 = vpop.f32.mrb[24].mxu0  ;;  %v1135_v19 = vadd.f32 %v2014_v14, %v1079_v62 }
 0x19e   :  { %v1180_v17 = vadd.f32 %v1179_v16, %v1124_v10  ;;  %v2102_v18 = vpop.f32.mrb[25].mxu0  ;;  %v2255_v10 = vld [vmem:[%s2901_s2 + $0xb0] sm:$0xff]  }
 0x19f   :  { %v2015_v24 = vpop.f32.mrb[20].mxu1  ;;  %v1182_v27 = vpop.f32.mrb[26].mxu0  ;;  %2067 = vmatpush3.bf16.msra.mxu0 %v2255_v10 }
 0x1a0   :  { %v2016_v29 = vpop.f32.mrb[21].mxu1  ;;  %v1201_v30 = vmax.f32 %v1180_v17, 0.0  ;;  %v1183_v31 = vadd.f32 %v1182_v27, %v1127_v13  ;;  %v2103_v32 = vpop.f32.mrb[27].mxu0  ;;  %2068 = vmatprep.subr.bf16.mxu0 %v2257_v40 }
 0x1a1   :  { %v2017_v33 = vadd.f32 %v2016_v29, %v2015_v24  ;;  %v2018_v39 = vpop.f32.mrb[22].mxu1 }
 0x1a2   :  { %v2019_v46 = vpop.f32.mrb[23].mxu1  ;;  %v1202_v49 = vmax.f32 %v1183_v31, 0.0  ;;  %v1208_v35 = vrot.slane %v1201_v30, 6  ;;  %v2256_v39 = vld [vmem:[%s2901_s2 + $0x108] sm:$0xff]  }
 0x1a3   :  { %v1140_v2 = vadd.f32 %v2017_v33, %v1084_v6  ;;  %2069 = vmatpush3.bf16.msra.mxu0 %v2258_v59  ;;  %v2253_v33 = vld [vmem:[%s2901_s2 + $0x100] sm:$0xff]  }
 0x1a4   :  { %v1209_v37 = vrot.slane %v1202_v49, 6 }
 0x1a5   :  { %v1187_v38 = vpop.f32.mrb[28].mxu0 }
 0x1a6   :  { %v1210_v42 = vsel %vm109_vm5, %v1208_v35, %v1209_v37  ;;  %v1188_v43 = vadd.f32 %v1187_v38, %v1132_v15  ;;  %v2106_v22 = vpop.f32.mrb[29].mxu0 }
 0x1a7   :  { %v1212_v12 = vmax.f32 %v1201_v30, %v1210_v42  ;;  %v1190_v25 = vpop.f32.mrb[30].mxu0  ;;  %v2259_v42 = vld [vmem:[%s2901_s2 + $0x110] sm:$0xff]  }
 0x1a8   :  { %v1203_v26 = vmax.f32 %v1188_v43, 0.0  ;;  %v1191_v44 = vadd.f32 %v1190_v25, %v1135_v19  ;;  %v2107_v23 = vpop.f32.mrb[31].mxu0  ;;  %v2260_v25 = vld [vmem:[%s2901_s2 + $0x118] sm:$0xff]  }
 0x1a9   :  { %v2261_v23 = vld [vmem:[%s2901_s2 + $0x120] sm:$0xff]  }
 0x1aa   :  { %v1214_v28 = vrot.slane %v1203_v26, 6  ;;  %v1204_v51 = vmax.f32 %v1191_v44, 0.0 }
 0x1ac   :  { %v1216_v20 = vmax.f32 %v1202_v49, %v1214_v28  ;;  %v1217_v45 = vmax.f32 %v1203_v26, %v1214_v28  ;;  %v1220_v3 = vrot.slane %v1204_v51, 6  ;;  %v2262_v28 = vld [vmem:[%s2901_s2 + $0x128] sm:$0xff]  }
 0x1ad   :  { %v1195_v47 = vpop.f32.mrb[32].mxu0 }
 0x1ae   :  { %v1227_v48 = vrot.slane %v1216_v20, 6  ;;  %v1228_v50 = vrot.slane %v1217_v45, 6  ;;  %v1196_v52 = vadd.f32 %v1195_v47, %v1140_v2  ;;  %v2110_v53 = vpop.f32.mrb[33].mxu0 }
 0x1af   :  { %v1198_v55 = vpop.f32.mrb[34].mxu0 }
 0x1b0   :  { %v1229_v60 = vsel %vm109_vm5, %v1227_v48, %v1228_v50  ;;  %v1235_v61 = vsel %vm132_vm4, %v1212_v12, %v1227_v48  ;;  %v1205_v62 = vmax.f32 %v1196_v52, 0.0  ;;  %v2111_v63 = vpop.f32.mrb[35].mxu0 }
 0x1b1   :  { %v1238_v0 = vrot.slane %v1235_v61, 1 }
 0x1b2   :  { %v1221_v21 = vrot.slane %v1205_v62, 6 }
 0x1b3   :  { %v1240_v4 = vmax.f32 %v1235_v61, %v1238_v0 }
 0x1b4   :  { %v1222_v6 = vsel %vm109_vm5, %v1220_v3, %v1221_v21  ;;  %v1754_v3 = vld [vmem:[%s2902_s3 + $0x26] sm:$0x1] }
 0x1b5   :  { %v1224_v7 = vmax.f32 %v1204_v51, %v1222_v6  ;;  %v1249_v8 = vrot.slane %v1240_v4, 2  ;;  %v1255_v9 = vrot.slane %v1240_v4, 6  ;;  %v1253_v27 = vrot.slane %v1240_v4, 4  ;;  %v1352_v51 = vld [vmem:[%s2902_s3 + $0x25] sm:$0x1] }
 0x1b7   :  { %v1233_v13 = vrot.slane %v1224_v7, 4  ;;  %v2143_v34 = vpack.i.bf16 %v1249_v8, %v1255_v9 }
 0x1b9   :  { %v1236_v41 = vsel %vm166_vm8, %v1229_v60, %v1233_v13  ;;  %2144 = vrot.lane.b32.xlu1 %v2143_v34, %s2291_s26  ;;  %v1245_v43 = vrot.slane %v1233_v13, 1 }
 0x1ba   :  { %v1242_v54 = vrot.slane %v1236_v41, 1 }
 0x1bb   :  { %v1247_v26 = vmax.f32 %v1233_v13, %v1245_v43 }
 0x1bc   :  { %v1244_v14 = vmax.f32 %v1236_v41, %v1242_v54 }
 0x1bd   :  { %v1279_v44 = vpack.c.bf16 %v1247_v26, %v1247_v26 }
 0x1be   :  { %v1260_v15 = vrot.slane %v1244_v14, 2  ;;  %v1266_v16 = vrot.slane %v1244_v14, 6  ;;  %v1264_v35 = vrot.slane %v1244_v14, 4 }
 0x1c0   :  { %v2148_v19 = vpack.i.bf16 %v1260_v15, %v1266_v16 }
 0x1c2   :  { %2149 = vrot.lane.b32.xlu0 %v2148_v19, %s2291_s26 }
 0x22b   :  { %v2145_v17 = vpop.permute.xlu1 %2144 }
 0x22c   :  { %v2147_v18 = vunpack.i.h.bf16 %v2145_v17  ;;  %v2146_v24 = vunpack.i.l.bf16 %v2145_v17 }
 0x22e   :  { %v1271_v29 = vsel %vm1270_vm10, %v1240_v4, %v2147_v18  ;;  %v1272_v30 = vsel %vm1270_vm10, %v1253_v27, %v2146_v24 }
 0x22f   :  { %v1275_v31 = vpack.c.bf16 %v1271_v29, %v1271_v29  ;;  %v1276_v32 = vpack.c.bf16 %v1272_v30, %v1272_v30 }
 0x231   :  { %1604 = vmatprep.mubr.bf16.mxu1 %v1276_v32 }
 0x232   :  { %1605 = vmatmul.mubr.bf16.vlgmr.msra.gmra.mrb[24].mxu1 %v1275_v31 }
 0x233   :  { %2113 = vmatpush3.bf16.msra.mxu1 %v2253_v33  ;;  %2120 = vmatprep.mubr.msk.bf16.mxu1 %vm2290_vm9, %v2289_v36 }
 0x234   :  { %v2150_v46 = vpop.permute.xlu0 %2149  ;;  %2114 = vmatprep.subr.bf16.mxu1 %v2289_v36 }
 0x235   :  { %v2152_v49 = vunpack.i.h.bf16 %v2150_v46  ;;  %v2151_v2 = vunpack.i.l.bf16 %v2150_v46 }
 0x237   :  { %v1273_v37 = vsel %vm1270_vm10, %v1244_v14, %v2152_v49  ;;  %2115 = vmatpush3.bf16.msra.mxu1 %v2256_v39  ;;  %v1274_v38 = vsel %vm1270_vm10, %v1264_v35, %v2151_v2 }
 0x238   :  { %v1277_v22 = vpack.c.bf16 %v1273_v37, %v1273_v37  ;;  %2116 = vmatprep.subr.bf16.mxu1 %v2289_v36  ;;  %v1278_v12 = vpack.c.bf16 %v1274_v38, %v1274_v38 }
 0x23a   :  { %1644 = vmatprep.mubr.bf16.mxu0 %v1278_v12 }
 0x23b   :  { %2117 = vmatpush3.bf16.msra.mxu1 %v2259_v42  ;;  %1645 = vmatmul.mubr.bf16.vlgmr.msra.gmra.mrb[36].mxu0 %v1277_v22 }
 0x23c   :  { %2118 = vmatprep.subr.bf16.mxu1 %v2289_v36 }
 0x23f   :  { %2119 = vmatpush3.bf16.msra.mxu1 %v2260_v25 }
 0x240   :  { %2124 = vmatprep.subr.bf16.mxu1 %v2289_v36 }
 0x242   :  { %2121 = vmatmul.mubr.msk.bf16.vlgmr.msra.gmra.mrb[28].mxu1 %vm1270_vm10, %v1279_v44 }
 0x243   :  { %2128 = vmatprep.mubr.msk.bf16.mxu1 %vm2290_vm9, %v2289_v36  ;;  %2125 = vmatpush3.bf16.msra.mxu1 %v2261_v23 }
 0x244   :  { %2126 = vmatprep.subr.bf16.mxu1 %v2289_v36 }
 0x247   :  { %2127 = vmatpush3.bf16.msra.mxu1 %v2262_v28 }
 0x305   :  { %v2048_v20 = vpop.f32.mrb[24].mxu1 }
 0x306   :  { %v2049_v45 = vpop.f32.mrb[25].mxu1 }
 0x307   :  { %v2050_v47 = vadd.f32 %v2049_v45, %v2048_v20  ;;  %v2051_v48 = vpop.f32.mrb[26].mxu1 }
 0x308   :  { %v2052_v50 = vpop.f32.mrb[27].mxu1 }
 0x309   :  { %v1607_v55 = vadd.f32 %v2050_v47, %v1352_v51 }
 0x30e   :  { %v2070_v52 = vpop.f32.mrb[36].mxu0 }
 0x30f   :  { %v2071_v53 = vpop.f32.mrb[37].mxu0 }
 0x310   :  { %v2072_v56 = vadd.f32 %v2071_v53, %v2070_v52  ;;  %v2073_v57 = vpop.f32.mrb[38].mxu0 }
 0x311   :  { %v2074_v36 = vpop.f32.mrb[39].mxu0 }
 0x312   :  { %v1647_v58 = vadd.f32 %v2072_v56, %v1607_v55 }
 0x315   :  { %v1686_v60 = vpop.f32.mrb[28].mxu1 }
 0x316   :  { %v1687_v61 = vadd.f32 %v1686_v60, %v1647_v58  ;;  %v2122_v62 = vpop.f32.mrb[29].mxu1 }
 0x317   :  { %v1689_v63 = vpop.f32.mrb[30].mxu1 }
 0x318   :  { %v1692_v11 = vmax.f32 %v1687_v61, 0.0  ;;  %v2123_v0 = vpop.f32.mrb[31].mxu1 }
 0x31a   :  { %v1693_v1 = vpack.c.bf16 %v1692_v11, %v1692_v11 }
 0x31c   :  { %2129 = vmatmul.mubr.msk.bf16.vlgmr.msra.gmra.mrb[32].mxu1 %vm1710_vm11, %v1693_v1 }
 0x3ef   :  { %v1748_v21 = vpop.f32.mrb[32].mxu1 }
 0x3f0   :  { %v1755_v4 = vadd.f32 %v1754_v3, %v1748_v21  ;;  %v2130_v5 = vpop.f32.mrb[33].mxu1 }
 0x3f1   :  { %v1751_v6 = vpop.f32.mrb[34].mxu1 }
 0x3f2   :  { %v2131_v7 = vpop.f32.mrb[35].mxu1  ;;  %1757 = vst.msk [vmem:[#allocation2] sm:$0x1] %vm1756_vm12, %v1755_v4 }
 0x3f3   :  { %2274 = shalt.err (!%p2271_p4)
}
 0x3f4   :  { %s2275_s21 = scalar_lea.hbm %s2903_s4, 16 }
 0x3f5   :  { %p2276_p5 = scmp.ne.s32.totalorder %s2903_s4, %s2275_s21  ;;  %p2279_p6 = scmp.lt.u32.totalorder %s2275_s21, %s2903_s4 }
 0x3f7   :  { %p2281_p7 = pnand %p2279_p6, %p2276_p5 }
 0x3f9   :  { %2284 = shalt.err (!%p2281_p7)
}
 0x3fa   :  { %1767 = dma.vmem_to_hbm [thread:$0]  %s1765_s18, 16, %s2903_s4, [#allocation3]  }
 0x3fb   :  { %2285 = dma.done.wait [#allocation3], 16  }
 0x3fc   :  { %2286 = vsyncadd [#allocation3], 4294967280 }
 0x3fd   :  { %1771 = vsyncpa [#allocation3], 1 }

</bundles_post_ra>
